<compile_context>
chip_gen: v7x
topology: tpu7x:2x2x1
jax: 0.10.0
libtpu: 0.0.40
codegen_flags: <defaults>
</compile_context>

<pallas_src>
import functools

import jax
import jax.numpy as jnp
import numpy as np
from jax.experimental import pallas as pl
from jax.experimental.pallas import tpu as pltpu


def _round_up(x, m):
    return (x + m - 1) // m * m


def _snce_kernel(lab_ref, q_ref, k_ref, km_ref, out_ref, *, inv_t, num_queries):
    """SocialNCE partial loss for a block of TB batch elements.

    Shapes (per grid step, padded lane-dense in the wrapper):
      lab_ref : (TB, Lp, 1)  int32      labels, -1 for masked / padded queries
      q_ref   : (TB, Lp, D)  f32|bf16   queries
      k_ref   : (TB, Sp, D)  f32|bf16   keys (not pre-transposed)
      km_ref  : (TB, 1,  Sp) f32        key mask (0. in masked / padded lanes)
      out_ref : (8, 128)     f32        sublane 0 = partial CE sum, 1 = count
    """
    lab = lab_ref[...]                                           # (TB, Lp, 1)
    q = q_ref[...]
    k = k_ref[...]
    km = km_ref[...]                                             # (TB, 1, Sp)

    tb, lp = lab.shape[0], lab.shape[1]
    sp = km.shape[2]

    # Query validity: the wrapper folds query_mask into labels (-1 == invalid),
    # so `lab >= 0` reproduces both masked_fill(~query_mask) and ignore_index.
    # (Assumes input labels are in [0, S) for unmasked queries, as in PyTorch.)
    qvalid = lab >= 0                                            # (TB, Lp, 1)
    pair_ok = jnp.logical_and(qvalid, km > 0.5)                  # (TB, Lp, Sp)

    # similarity = einsum('nld,nsd->nls') on the MXU; RHS transpose handled
    # in-kernel, keys streamed straight from HBM.
    sim_raw = jnp.einsum('bld,bsd->bls', q, k,
                         preferred_element_type=jnp.float32)     # (TB, Lp, Sp)

    # Mask once: the reference value uses finfo.min, the softmax operand uses a
    # finite sentinel so no -inf arithmetic is ever produced.
    fill = jnp.float32(jnp.finfo(jnp.float32).min)
    neg_big = jnp.float32(-1e30)
    sim = jnp.where(pair_ok, sim_raw, fill)
    scaled = jnp.where(pair_ok, sim_raw * jnp.float32(inv_t), neg_big)

    # softmax(sim / T) over the query axis (axis=1).
    m = jnp.max(scaled, axis=1, keepdims=True)                   # (TB, 1, Sp)
    p = jnp.exp(scaled - m)
    denom = jnp.sum(p, axis=1, keepdims=True)                    # (TB, 1, Sp)
    r = pl.reciprocal(denom, approx=True)                        # EUP slot
    r = r * (2.0 - denom * r)                                    # Newton refine
    logits = sim * (p * r) * jnp.float32(num_queries)            # (TB, Lp, Sp)

    # one-hot rebuilt in-kernel from int labels (lab == -1 -> all-zero row).
    sidx = jax.lax.broadcasted_iota(jnp.int32, (tb, lp, sp), 2)
    onehot = (sidx == lab).astype(jnp.float32)                   # (TB, Lp, Sp)

    # CrossEntropyLoss(ignore_index=-1) partial (sum, count); the mean divide
    # is finished in the wrapper.  All operands are finite, so a multiply by
    # the validity mask is safe (no inf * 0).
    mx = jnp.max(logits, axis=2, keepdims=True)                  # (TB, Lp, 1)
    lse = jnp.log(jnp.sum(jnp.exp(logits - mx), axis=2, keepdims=True)) + mx
    picked = jnp.sum(logits * onehot, axis=2, keepdims=True)     # (TB, Lp, 1)
    validf = qvalid.astype(jnp.float32)
    per_row = (lse - picked) * validf

    total = jnp.sum(per_row)
    cnt = jnp.sum(validf)

    # Lane-dense full-vreg store of the two partial scalars (one per block).
    row = jax.lax.broadcasted_iota(jnp.int32, out_ref.shape, 0)
    out_ref[...] = jnp.where(row == 0, total, jnp.where(row == 1, cnt, 0.0))


def social_nce_loss(queries, keys, labels, query_mask, key_mask,
                    temperature=0.1, batch_block=8, use_bf16_inputs=False):
    """Pallas wrapper reproducing SocialNCE.forward (encoder=None).

    queries: (N, L, D) float; keys: (N, S, D) float; labels: (N*L,) int
    query_mask: (N, L) bool; key_mask: (N, S) bool.
    `use_bf16_inputs=True` halves q/k HBM bytes (v6e/v7x); softmax/CE stay f32.
    """
    # TODO(synk): the optional `encoder` branch (keys as raw [cx,cy,w,h]
    # states) is not implemented; keys must already be (N, S, D) embeddings.
    N, L, D = queries.shape
    S = keys.shape[1]

    Lp = _round_up(L, 8)               # sublane pad for sim/logits tiles
    Sp = _round_up(S, 128)             # lane pad; D stays unpadded (MXU K=D)
    tb = max(1, min(batch_block, N))   # batch elements per grid step
    Np = _round_up(N, tb)
    grid_n = Np // tb
    # On v7x: pick batch_block so grid_n is even (>=2) for the two TensorCores
    # and each step moves >= ~1 MB of HBM; tile against the 64 MiB VMEM.

    in_dtype = jnp.bfloat16 if use_bf16_inputs else jnp.float32

    q = jnp.pad(queries.astype(in_dtype),
                ((0, Np - N), (0, Lp - L), (0, 0)))              # (Np, Lp, D)
    k = jnp.pad(keys.astype(in_dtype),
                ((0, Np - N), (0, Sp - S), (0, 0)))              # (Np, Sp, D)
    km = jnp.pad(key_mask.astype(jnp.float32),
                 ((0, Np - N), (0, Sp - S)))[:, None, :]         # (Np, 1, Sp)

    lab = jnp.where(query_mask, labels.reshape(N, L).astype(jnp.int32), -1)
    lab = jnp.pad(lab, ((0, Np - N), (0, Lp - L)),
                  constant_values=-1)[:, :, None]                # (Np, Lp, 1)

    kern = functools.partial(_snce_kernel,
                             inv_t=1.0 / float(temperature),
                             num_queries=float(L))

    itemsize = jnp.dtype(in_dtype).itemsize
    cost = pl.CostEstimate(
        flops=2 * Np * Lp * Sp * D + 12 * Np * Lp * Sp,
        transcendentals=3 * Np * Lp * Sp,
        bytes_accessed=(int(q.size) + int(k.size)) * itemsize
                       + (int(km.size) + int(lab.size)) * 4
                       + grid_n * 8 * 128 * 4)

    parts = pl.pallas_call(
        kern,
        grid=(grid_n,),
        out_shape=jax.ShapeDtypeStruct((grid_n, 8, 128), jnp.float32),
        in_specs=[
            pl.BlockSpec((tb, Lp, 1), lambda i: (i, 0, 0)),
            pl.BlockSpec((tb, Lp, D), lambda i: (i, 0, 0)),
            pl.BlockSpec((tb, Sp, D), lambda i: (i, 0, 0)),
            pl.BlockSpec((tb, 1, Sp), lambda i: (i, 0, 0)),
        ],
        out_specs=pl.BlockSpec((None, 8, 128), lambda i: (i, 0, 0)),
        compiler_params=pltpu.CompilerParams(
            dimension_semantics=("parallel",)),
        cost_estimate=cost,
    )(lab, q, k, km)

    total = jnp.sum(parts[:, 0, 0])
    cnt = jnp.sum(parts[:, 1, 0])
    # NaN when every query is masked (0/0), identical to PyTorch's CE when all
    # targets are ignore_index.  Fully-masked *key* columns diverge from the
    # reference (finite sentinel here vs NaN softmax there) -- documented.
    return total / cnt


def social_nce_ref(queries, keys, labels, query_mask, key_mask,
                   temperature=0.1):
    """Plain-JAX reference (mirrors the PyTorch module)."""
    sim = jnp.einsum('nld,nsd->nls', queries, keys)
    fill_value = jnp.finfo(jnp.float32).min
    sim_mask = query_mask[:, :, None] & key_mask[:, None, :]
    sim = jnp.where(sim_mask, sim, fill_value)
    L = sim.shape[1]
    logits = sim * jax.nn.softmax(sim / temperature, axis=1) * L
    N, Lq, S = logits.shape
    logits = logits.reshape(N * Lq, S)
    labels_m = jnp.where(query_mask.reshape(-1), labels, -1)
    valid = (labels_m != -1).astype(jnp.float32)
    logp = jax.nn.log_softmax(logits, axis=-1)
    picked = jnp.take_along_axis(logp, jnp.clip(labels_m, 0)[:, None], axis=1)[:, 0]
    return jnp.sum(-picked * valid) / jnp.sum(valid)


if __name__ == "__main__":
    key = jax.random.PRNGKey(0)
    N, L, S, D = 2, 8, 16, 32
    kq, kk, kl, km_ = jax.random.split(key, 4)

    queries = jax.random.normal(kq, (N, L, D), dtype=jnp.float32)
    keys = jax.random.normal(kk, (N, S, D), dtype=jnp.float32)
    labels = jax.random.randint(kl, (N * L,), 0, S, dtype=jnp.int32)

    # query_mask with some invalid queries (exercises masked_fill +
    # ignore_index); key_mask all valid so no fully-masked softmax columns
    # (those would be NaN in PyTorch too).
    query_mask = jax.random.bernoulli(km_, 0.7, (N, L))
    query_mask = query_mask.at[:, 0].set(True)
    key_mask = jnp.ones((N, S), dtype=jnp.bool_)

    loss = jax.block_until_ready(
        social_nce_loss(queries, keys, labels, query_mask, key_mask,
                        temperature=0.1))
    ref = jax.block_until_ready(
        social_nce_ref(queries, keys, labels, query_mask, key_mask,
                       temperature=0.1))

    np.testing.assert_allclose(np.asarray(loss), np.asarray(ref),
                               rtol=5e-5, atol=5e-5)
    print("KERNEL_OK")
</pallas_src>

<mosaic_0001>
module attributes {stable_mosaic.version = 11 : i64} {
  func.func @_snce_kernel(%arg0: i32, %arg1: memref<2x8x1xi32, #tpu.memory_space<vmem>>, %arg2: memref<2x8x32xf32, #tpu.memory_space<vmem>>, %arg3: memref<2x128x32xf32, #tpu.memory_space<vmem>>, %arg4: memref<2x1x128xf32, #tpu.memory_space<vmem>>, %arg5: memref<1x8x128xf32, #tpu.memory_space<vmem>>) attributes {dimension_semantics = [#tpu.dimension_semantics<parallel>], iteration_bounds = array<i64: 1>, scalar_prefetch = 0 : i64, scratch_operands = 0 : i64, tpu.core_type = #tpu.core_type<tc>, window_params = [{transform_indices = @transform_0, window_bounds = array<i64: 2, 8, 1>}, {transform_indices = @transform_1, window_bounds = array<i64: 2, 8, 32>}, {transform_indices = @transform_2, window_bounds = array<i64: 2, 128, 32>}, {transform_indices = @transform_3, window_bounds = array<i64: 2, 1, 128>}, {transform_indices = @transform_4, window_bounds = array<i64: 1, 8, 128>}]} {
    %c0 = arith.constant 0 : index
    %c0_0 = arith.constant 0 : index
    %c0_1 = arith.constant 0 : index
    %0 = vector.load %arg1[%c0, %c0_0, %c0_1] : memref<2x8x1xi32, #tpu.memory_space<vmem>>, vector<2x8x1xi32>
    %c0_2 = arith.constant 0 : index
    %c0_3 = arith.constant 0 : index
    %c0_4 = arith.constant 0 : index
    %1 = vector.load %arg2[%c0_2, %c0_3, %c0_4] : memref<2x8x32xf32, #tpu.memory_space<vmem>>, vector<2x8x32xf32>
    %c0_5 = arith.constant 0 : index
    %c0_6 = arith.constant 0 : index
    %c0_7 = arith.constant 0 : index
    %2 = vector.load %arg3[%c0_5, %c0_6, %c0_7] : memref<2x128x32xf32, #tpu.memory_space<vmem>>, vector<2x128x32xf32>
    %c0_8 = arith.constant 0 : index
    %c0_9 = arith.constant 0 : index
    %c0_10 = arith.constant 0 : index
    %3 = vector.load %arg4[%c0_8, %c0_9, %c0_10] : memref<2x1x128xf32, #tpu.memory_space<vmem>>, vector<2x1x128xf32>
    %c0_i32 = arith.constant 0 : i32
    %4 = vector.broadcast %c0_i32 : i32 to vector<2x8x1xi32>
    %5 = arith.cmpi sge, %0, %4 : vector<2x8x1xi32>
    %cst = arith.constant 5.000000e-01 : f32
    %6 = vector.broadcast %cst : f32 to vector<2x1x128xf32>
    %7 = arith.cmpf ogt, %3, %6 : vector<2x1x128xf32>
    %8 = vector.broadcast %5 : vector<2x8x1xi1> to vector<2x8x128xi1>
    %9 = vector.broadcast %7 : vector<2x1x128xi1> to vector<2x8x128xi1>
    %10 = arith.andi %8, %9 : vector<2x8x128xi1>
    "tpu.trace_start"() <{level = 10 : i32, message = "bld,bsd->bls"}> : () -> ()
    %cst_11 = arith.constant dense<0.000000e+00> : vector<2x8x128xf32>
    %11 = tpu.matmul %1, %2, %cst_11 {dimension_numbers = #tpu.dot_dimension_numbers<[2], [2], [1], [1], [0, 0, 0, 1, 1, 1], [0], [0]>} : vector<2x8x32xf32>, vector<2x128x32xf32>, vector<2x8x128xf32> -> vector<2x8x128xf32>
    %cst_12 = arith.constant -3.40282347E+38 : f32
    "tpu.trace_stop"() : () -> ()
    %12 = vector.broadcast %cst_12 : f32 to vector<2x8x128xf32>
    %13 = arith.select %10, %11, %12 : vector<2x8x128xi1>, vector<2x8x128xf32>
    %cst_13 = arith.constant 1.000000e+01 : f32
    %14 = vector.broadcast %cst_13 : f32 to vector<2x8x128xf32>
    %15 = arith.mulf %11, %14 : vector<2x8x128xf32>
    %cst_14 = arith.constant -1.000000e+30 : f32
    %16 = vector.broadcast %cst_14 : f32 to vector<2x8x128xf32>
    %17 = arith.select %10, %15, %16 : vector<2x8x128xi1>, vector<2x8x128xf32>
    %cst_15 = arith.constant dense<0xFF800000> : vector<2x128xf32>
    %18 = vector.multi_reduction <maximumf>, %17, %cst_15 [1] : vector<2x8x128xf32> to vector<2x128xf32>
    %19 = vector.shape_cast %18 : vector<2x128xf32> to vector<2x1x128xf32>
    %20 = vector.broadcast %19 : vector<2x1x128xf32> to vector<2x8x128xf32>
    %21 = arith.subf %17, %20 : vector<2x8x128xf32>
    %22 = math.exp %21 : vector<2x8x128xf32>
    %cst_16 = arith.constant dense<0.000000e+00> : vector<2x128xf32>
    %23 = vector.multi_reduction <add>, %22, %cst_16 [1] : vector<2x8x128xf32> to vector<2x128xf32>
    %24 = vector.shape_cast %23 : vector<2x128xf32> to vector<2x1x128xf32>
    %25 = tpu.reciprocal %24 {approx = true} : vector<2x1x128xf32> -> vector<2x1x128xf32>
    %26 = arith.mulf %24, %25 : vector<2x1x128xf32>
    %cst_17 = arith.constant 2.000000e+00 : f32
    %27 = vector.broadcast %cst_17 : f32 to vector<2x1x128xf32>
    %28 = arith.subf %27, %26 : vector<2x1x128xf32>
    %29 = arith.mulf %25, %28 : vector<2x1x128xf32>
    %30 = vector.broadcast %29 : vector<2x1x128xf32> to vector<2x8x128xf32>
    %31 = arith.mulf %22, %30 : vector<2x8x128xf32>
    %32 = arith.mulf %13, %31 : vector<2x8x128xf32>
    %cst_18 = arith.constant 8.000000e+00 : f32
    %33 = vector.broadcast %cst_18 : f32 to vector<2x8x128xf32>
    %34 = arith.mulf %32, %33 : vector<2x8x128xf32>
    %35 = tpu.iota {dimensions = array<i32: 2>} : vector<2x8x128xi32>
    %36 = vector.broadcast %0 : vector<2x8x1xi32> to vector<2x8x128xi32>
    %37 = arith.cmpi eq, %35, %36 : vector<2x8x128xi32>
    %38 = arith.extui %37 : vector<2x8x128xi1> to vector<2x8x128xi32>
    %39 = arith.sitofp %38 : vector<2x8x128xi32> to vector<2x8x128xf32>
    %cst_19 = arith.constant dense<0xFF800000> : vector<2x8xf32>
    %40 = vector.multi_reduction <maximumf>, %34, %cst_19 [2] : vector<2x8x128xf32> to vector<2x8xf32>
    %41 = vector.shape_cast %40 : vector<2x8xf32> to vector<2x8x1xf32>
    %42 = vector.broadcast %41 : vector<2x8x1xf32> to vector<2x8x128xf32>
    %43 = arith.subf %34, %42 : vector<2x8x128xf32>
    %44 = math.exp %43 : vector<2x8x128xf32>
    %cst_20 = arith.constant dense<0.000000e+00> : vector<2x8xf32>
    %45 = vector.multi_reduction <add>, %44, %cst_20 [2] : vector<2x8x128xf32> to vector<2x8xf32>
    %46 = vector.shape_cast %45 : vector<2x8xf32> to vector<2x8x1xf32>
    %47 = math.log %46 : vector<2x8x1xf32>
    %48 = arith.addf %47, %41 : vector<2x8x1xf32>
    %49 = arith.mulf %34, %39 : vector<2x8x128xf32>
    %cst_21 = arith.constant dense<0.000000e+00> : vector<2x8xf32>
    %50 = vector.multi_reduction <add>, %49, %cst_21 [2] : vector<2x8x128xf32> to vector<2x8xf32>
    %51 = vector.shape_cast %50 : vector<2x8xf32> to vector<2x8x1xf32>
    %52 = arith.extui %5 : vector<2x8x1xi1> to vector<2x8x1xi32>
    %53 = arith.sitofp %52 : vector<2x8x1xi32> to vector<2x8x1xf32>
    %54 = arith.subf %48, %51 : vector<2x8x1xf32>
    %55 = arith.mulf %54, %53 : vector<2x8x1xf32>
    %56 = vector.shape_cast %55 : vector<2x8x1xf32> to vector<1x2x8x1xf32>
    %cst_22 = arith.constant dense<0.000000e+00> : vector<1xf32>
    %57 = vector.multi_reduction <add>, %56, %cst_22 [1, 2, 3] : vector<1x2x8x1xf32> to vector<1xf32>
    %58 = vector.shape_cast %57 : vector<1xf32> to vector<1x1x1x1xf32>
    %59 = vector.extract %58[0, 0, 0, 0] : f32 from vector<1x1x1x1xf32>
    %60 = vector.shape_cast %53 : vector<2x8x1xf32> to vector<1x2x8x1xf32>
    %cst_23 = arith.constant dense<0.000000e+00> : vector<1xf32>
    %61 = vector.multi_reduction <add>, %60, %cst_23 [1, 2, 3] : vector<1x2x8x1xf32> to vector<1xf32>
    %62 = vector.shape_cast %61 : vector<1xf32> to vector<1x1x1x1xf32>
    %63 = vector.extract %62[0, 0, 0, 0] : f32 from vector<1x1x1x1xf32>
    %64 = tpu.iota {dimensions = array<i32: 0>} : vector<8x128xi32>
    %c0_i32_24 = arith.constant 0 : i32
    %65 = vector.broadcast %c0_i32_24 : i32 to vector<8x128xi32>
    %66 = arith.cmpi eq, %64, %65 : vector<8x128xi32>
    %c1_i32 = arith.constant 1 : i32
    %67 = vector.broadcast %c1_i32 : i32 to vector<8x128xi32>
    %68 = arith.cmpi eq, %64, %67 : vector<8x128xi32>
    %cst_25 = arith.constant 0.000000e+00 : f32
    %69 = vector.broadcast %63 : f32 to vector<8x128xf32>
    %70 = vector.broadcast %cst_25 : f32 to vector<8x128xf32>
    %71 = arith.select %68, %69, %70 : vector<8x128xi1>, vector<8x128xf32>
    %72 = vector.broadcast %59 : f32 to vector<8x128xf32>
    %73 = arith.select %66, %72, %71 : vector<8x128xi1>, vector<8x128xf32>
    %c0_26 = arith.constant 0 : index
    %c0_27 = arith.constant 0 : index
    %c0_28 = arith.constant 0 : index
    %74 = vector.load %arg5[%c0_26, %c0_27, %c0_28] : memref<1x8x128xf32, #tpu.memory_space<vmem>>, vector<1x8x128xf32>
    %75 = vector.shape_cast %74 : vector<1x8x128xf32> to vector<8x128xf32>
    %76 = vector.shape_cast %73 : vector<8x128xf32> to vector<1x8x128xf32>
    tpu.vector_store %arg5[%c0_26, %c0_27, %c0_28], %76 {strides = array<i32>} : memref<1x8x128xf32, #tpu.memory_space<vmem>>, vector<1x8x128xf32>,
    return
  }
  func.func @transform_0(%arg0: i32) -> (i32, i32, i32) {
    %c0_i32 = arith.constant 0 : i32
    %c0_i32_0 = arith.constant 0 : i32
    %c0_i32_1 = arith.constant 0 : i32
    return %arg0, %c0_i32, %c0_i32_0 : i32, i32, i32
  }
  func.func @transform_1(%arg0: i32) -> (i32, i32, i32) {
    %c0_i32 = arith.constant 0 : i32
    %c0_i32_0 = arith.constant 0 : i32
    %c0_i32_1 = arith.constant 0 : i32
    return %arg0, %c0_i32, %c0_i32_0 : i32, i32, i32
  }
  func.func @transform_2(%arg0: i32) -> (i32, i32, i32) {
    %c0_i32 = arith.constant 0 : i32
    %c0_i32_0 = arith.constant 0 : i32
    %c0_i32_1 = arith.constant 0 : i32
    return %arg0, %c0_i32, %c0_i32_0 : i32, i32, i32
  }
  func.func @transform_3(%arg0: i32) -> (i32, i32, i32) {
    %c0_i32 = arith.constant 0 : i32
    %c0_i32_0 = arith.constant 0 : i32
    %c0_i32_1 = arith.constant 0 : i32
    return %arg0, %c0_i32, %c0_i32_0 : i32, i32, i32
  }
  func.func @transform_4(%arg0: i32) -> (i32, i32, i32) {
    %c0_i32 = arith.constant 0 : i32
    %c0_i32_0 = arith.constant 0 : i32
    %c0_i32_1 = arith.constant 0 : i32
    return %arg0, %c0_i32, %c0_i32_0 : i32, i32, i32
  }
}

</mosaic_0001>

<bundles_post_ra>
// kernel: tpu_custom_call.1
= control target key start
LH: loop header
LB: loop body
LE: loop exit
PB: predicated region body
PF: predicated region fallthrough
CT: control target
= control target key end

     0   :  { %vm84_vm0 = vcmask 261120   ;;  %v728_v3 = vmov 0.0|0.0   ;;  %vm729_vm2 = vmmov 0   ;;  %v730_v8 = vmov 0.0   ;;  %s991_s0 = inlined_call_operand.vmem [shape: s32[2,8,1], index: 0, kind: input, shape index: {}]   ;;  %s992_s1 = inlined_call_operand.vmem [shape: f32[2,8,32], index: 1, kind: input, shape index: {}]   ;;  %s993_s2 = inlined_call_operand.vmem [shape: f32[2,128,32], index: 2, kind: input, shape index: {}]   ;;  %s994_s3 = inlined_call_operand.vmem [shape: f32[2,1,128], index: 3, kind: input, shape index: {}]   ;;  %s995_s4 = inlined_call_operand.hbm [shape: f32[1,8,128], index: 4, kind: output, shape index: {}]  }
   0x1   :  { %v22_v0 = vld [vmem:[%s993_s2] sm:$0xff]  ;;  %v23_v1 = vld [vmem:[%s993_s2 + $0x8] sm:$0xff]  ;;  %613 = vmatprep.subr.bf16.mxu0 %v728_v3  ;;  %645 = vmatprep.subr.bf16.mxu1 %v728_v3  ;;  %vm771_vm1 = vmpackc.low %vm84_vm0, %vm84_vm0  ;;  %v731_v9 = vmov 0  }
   0x2   :  { %v38_v2 = vld [vmem:[%s993_s2 + $0x80] sm:$0xff]  ;;  %v614_v4 = vpack.c.bf16 %v23_v1, %v22_v0  ;;  %v39_v6 = vld [vmem:[%s993_s2 + $0x88] sm:$0xff]  ;;  %575 = vmatprep.mubr.msk.f32.mxu0 %vm729_vm2, %v730_v8  ;;  %610 = vmatprep.mubr.msk.f32.mxu1 %vm729_vm2, %v730_v8  ;;  %v24_v10 = vld [vmem:[%s993_s2 + $0x10] sm:$0xff] }
   0x3   :  { %v646_v7 = vpack.c.bf16 %v39_v6, %v38_v2  ;;  %686 = vset.pattern.permute.xlu0 %v731_v9  ;;  %v25_v11 = vld [vmem:[%s993_s2 + $0x18] sm:$0xff]  ;;  %v40_v12 = vld [vmem:[%s993_s2 + $0x90] sm:$0xff]  ;;  %687 = vset.pattern.permute.xlu1 %v731_v9  ;;  %v26_v16 = vld [vmem:[%s993_s2 + $0x20] sm:$0xff] }
   0x4   :  { %616 = vmatpush3.bf16.xpose.msk.msra.mxu0 %vm771_vm1, %v614_v4  ;;  %v41_v13 = vld [vmem:[%s993_s2 + $0x98] sm:$0xff]  ;;  %v618_v14 = vpack.c.bf16 %v25_v11, %v24_v10  ;;  %v808_v17 = vld [vmem:[%s991_s0] sm:$0xff]  ;;  %v27_v18 = vld [vmem:[%s993_s2 + $0x28] sm:$0xff] }
   0x5   :  { %648 = vmatpush3.bf16.xpose.msk.msra.mxu1 %vm771_vm1, %v646_v7  ;;  %617 = vmatprep.subr.bf16.mxu0 %v728_v3  ;;  %v650_v15 = vpack.c.bf16 %v41_v13, %v40_v12  ;;  %vm56_vm3 = vcmp.ge.s32.totalorder %v808_v17, 0  ;;  %v820_v19 = vld [vmem:[%s991_s0 + $0x8] sm:$0xff] }
   0x6   :  { %649 = vmatprep.subr.bf16.mxu1 %v728_v3 }
   0xc   :  { %620 = vmatpush3.bf16.xpose.msk.msra.mxu0 %vm771_vm1, %v618_v14 }
   0xd   :  { %652 = vmatpush3.bf16.xpose.msk.msra.mxu1 %vm771_vm1, %v650_v15  ;;  %621 = vmatprep.subr.bf16.mxu0 %v728_v3 }
   0xe   :  { %9 = vsyncpa [#allocation3], 0  ;;  %653 = vmatprep.subr.bf16.mxu1 %v728_v3  ;;  %v42_v20 = vld [vmem:[%s993_s2 + $0xa0] sm:$0xff]  ;;  %v43_v21 = vld [vmem:[%s993_s2 + $0xa8] sm:$0xff]  ;;  %v60_v22 = vsel %vm56_vm3, 1, %v731_v9  ;;  %vm57_vm4 = vcmp.ge.s32.totalorder %v820_v19, 0  ;;  %v622_v23 = vpack.c.bf16 %v27_v18, %v26_v16  ;;  %v72_v58 = vlaneseq }
   0xf   :  { %63 = vperm.xlu0 %686, %v60_v22   ;;  %v61_v24 = vsel %vm57_vm4, 1, %v731_v9  ;;  %v654_v25 = vpack.c.bf16 %v43_v21, %v42_v20  ;;  %v28_v26 = vld [vmem:[%s993_s2 + $0x30] sm:$0xff]  ;;  %v29_v27 = vld [vmem:[%s993_s2 + $0x38] sm:$0xff]  ;;  %v30_v32 = vld [vmem:[%s993_s2 + $0x40] sm:$0xff]  ;;  %vm423_vm15 = vcmask 7168  }
  0x10   :  { %v44_v28 = vld [vmem:[%s993_s2 + $0xb0] sm:$0xff]  ;;  %v45_v29 = vld [vmem:[%s993_s2 + $0xb8] sm:$0xff]  ;;  %v626_v30 = vpack.c.bf16 %v29_v27, %v28_v26  ;;  %v31_v33 = vld [vmem:[%s993_s2 + $0x48] sm:$0xff]  ;;  %v943_v60 = vshrl.u32 %v72_v58, 7 }
  0x11   :  { %v658_v31 = vpack.c.bf16 %v45_v29, %v44_v28  ;;  %v46_v34 = vld [vmem:[%s993_s2 + $0xc0] sm:$0xff]  ;;  %v47_v35 = vld [vmem:[%s993_s2 + $0xc8] sm:$0xff]  ;;  %v630_v36 = vpack.c.bf16 %v31_v33, %v30_v32  ;;  %v32_v38 = vld [vmem:[%s993_s2 + $0x50] sm:$0xff] }
  0x12   :  { %v662_v37 = vpack.c.bf16 %v47_v35, %v46_v34  ;;  %v33_v39 = vld [vmem:[%s993_s2 + $0x58] sm:$0xff]  ;;  %v48_v40 = vld [vmem:[%s993_s2 + $0xd0] sm:$0xff]  ;;  %v34_v44 = vld [vmem:[%s993_s2 + $0x60] sm:$0xff]  ;;  %v74_v62 = vsub.s32 0, %v943_v60 }
  0x13   :  { %66 = vperm.xlu0 %686, %v61_v24   ;;  %v49_v41 = vld [vmem:[%s993_s2 + $0xd8] sm:$0xff]  ;;  %v634_v42 = vpack.c.bf16 %v33_v39, %v32_v38  ;;  %v35_v45 = vld [vmem:[%s993_s2 + $0x68] sm:$0xff]  ;;  %v50_v46 = vld [vmem:[%s993_s2 + $0xe0] sm:$0xff] }
  0x14   :  { %624 = vmatpush3.bf16.xpose.msk.msra.mxu0 %vm771_vm1, %v622_v23  ;;  %v666_v43 = vpack.c.bf16 %v49_v41, %v48_v40  ;;  %v51_v47 = vld [vmem:[%s993_s2 + $0xe8] sm:$0xff]  ;;  %v638_v48 = vpack.c.bf16 %v35_v45, %v34_v44  ;;  %v36_v50 = vld [vmem:[%s993_s2 + $0x70] sm:$0xff]  ;;  %v37_v51 = vld [vmem:[%s993_s2 + $0x78] sm:$0xff] }
  0x15   :  { %656 = vmatpush3.bf16.xpose.msk.msra.mxu1 %vm771_vm1, %v654_v25  ;;  %625 = vmatprep.subr.bf16.mxu0 %v728_v3  ;;  %v670_v49 = vpack.c.bf16 %v51_v47, %v50_v46  ;;  %v52_v52 = vld [vmem:[%s993_s2 + $0xf0] sm:$0xff]  ;;  %v53_v53 = vld [vmem:[%s993_s2 + $0xf8] sm:$0xff]  ;;  %v642_v54 = vpack.c.bf16 %v37_v51, %v36_v50  ;;  %v20_v56 = vld [vmem:[%s992_s1] sm:$0xff] }
  0x16   :  { %657 = vmatprep.subr.bf16.mxu1 %v728_v3  ;;  %v674_v55 = vpack.c.bf16 %v53_v53, %v52_v52  ;;  %v21_v57 = vld [vmem:[%s992_s1 + $0x8] sm:$0xff]  ;;  %v54_v59 = vld [vmem:[%s994_s3] sm:$0x1]  ;;  %v55_v61 = vld [vmem:[%s994_s3 + $0x1] sm:$0x1]  ;;  %s732_s3 = smov [#allocation2]  }
  0x17   :  { %380 = vperm.xlu0 %686, %v808_v17   ;;  %vm58_vm5 = vcmp.gt.f32.partialorder %v54_v59, 0.5  ;;  %vm59_vm6 = vcmp.gt.f32.partialorder %v55_v61, 0.5  ;;  %s463_s10 = sshll.u32 %s732_s3, 4  ;;  %s464_s10 = int_to_ptr.vmem [resolvable:$true] %s463_s10 }
  0x18   :  { %v70_v63 = vsel %vm58_vm5, 1, %v731_v9  ;;  %v71_v1 = vsel %vm59_vm6, 1, %v731_v9  ;;  %s704_s12 = scalar_lea.vmem %s464_s10, 128  ;;  %p709_p1 = scmp.lt.s32.totalorder %s464_s10, %s464_s10 }
  0x19   :  { %v75_v2 = vrot.slane %v70_v63, %v74_v62  ;;  %p705_p0 = scmp.ne.s32.totalorder %s464_s10, %s704_s12  ;;  %p710_p2 = scmp.lt.s32.totalorder %s704_s12, %s704_s12 }
  0x1b   :  { %vm80_vm7 = vcmp.eq.s32.totalorder %v75_v2, 1  ;;  %p711_p3 = por %p710_p2, %p709_p1 }
  0x1c   :  { %628 = vmatpush3.bf16.xpose.msk.msra.mxu0 %vm771_vm1, %v626_v30 }
  0x1d   :  { %660 = vmatpush3.bf16.xpose.msk.msra.mxu1 %vm771_vm1, %v658_v31  ;;  %629 = vmatprep.subr.bf16.mxu0 %v728_v3  ;;  %p712_p4 = pnand %p711_p3, %p705_p0 }
  0x1e   :  { %661 = vmatprep.subr.bf16.mxu1 %v728_v3 }
  0x24   :  { %632 = vmatpush3.bf16.xpose.msk.msra.mxu0 %vm771_vm1, %v630_v36 }
  0x25   :  { %664 = vmatpush3.bf16.xpose.msk.msra.mxu1 %vm771_vm1, %v662_v37  ;;  %633 = vmatprep.subr.bf16.mxu0 %v728_v3 }
  0x26   :  { %665 = vmatprep.subr.bf16.mxu1 %v728_v3 }
  0x2c   :  { %636 = vmatpush3.bf16.xpose.msk.msra.mxu0 %vm771_vm1, %v634_v42 }
  0x2d   :  { %668 = vmatpush3.bf16.xpose.msk.msra.mxu1 %vm771_vm1, %v666_v43  ;;  %637 = vmatprep.subr.bf16.mxu0 %v728_v3 }
  0x2e   :  { %669 = vmatprep.subr.bf16.mxu1 %v728_v3 }
  0x34   :  { %640 = vmatpush3.bf16.xpose.msk.msra.mxu0 %vm771_vm1, %v638_v48 }
  0x35   :  { %672 = vmatpush3.bf16.xpose.msk.msra.mxu1 %vm771_vm1, %v670_v49  ;;  %641 = vmatprep.subr.bf16.mxu0 %v728_v3 }
  0x36   :  { %673 = vmatprep.subr.bf16.mxu1 %v728_v3  ;;  %v79_v3 = vrot.slane %v71_v1, %v74_v62 }
  0x38   :  { %vm81_vm9 = vcmp.eq.s32.totalorder %v79_v3, 1 }
  0x3c   :  { %644 = vmatpush3.bf16.xpose.msk.msra.mxu0 %vm771_vm1, %v642_v54 }
  0x3d   :  { %676 = vmatpush3.bf16.xpose.msk.msra.mxu1 %vm771_vm1, %v674_v55  ;;  %vm450_vm1 = vcmp.eq.s32.totalorder %v943_v60, 0 }
  0x43   :  { %576 = vmatmul.mubr.msk.f32.vlgmr.msra.gmra.mrb[0].mxu0 %vm84_vm0, %v20_v56 }
  0x44   :  { %611 = vmatmul.mubr.msk.f32.vlgmr.msra.gmra.mrb[0].mxu1 %vm84_vm0, %v21_v57  ;;  %vm451_vm0 = vcmp.eq.s32.totalorder %v943_v60, 1 }
  0x8e   :  { %v64_v0 = vpop.permute.xlu0 %63 }
  0x8f   :  { %vm68_vm8 = vcmp.eq.s32.totalorder %v64_v0, 1 }
  0x90   :  { %vm951_vm11 = vmand %vm68_vm8, %vm80_vm7 }
  0x92   :  { %v67_v4 = vpop.permute.xlu0 %66 }
  0x93   :  { %vm69_vm10 = vcmp.eq.s32.totalorder %v67_v4, 1 }
  0x94   :  { %vm955_vm12 = vmand %vm69_vm10, %vm81_vm9 }
 0x116   :  { %v202_v7 = vpop.f32.mrb[0].mxu0 }
 0x117   :  { %v327_v10 = vsel %vm951_vm11, %v202_v7, -3.4028235e+38  ;;  %v329_v9 = vmul.f32 10.0, %v202_v7  ;;  %v323_v11 = vpop.f32.mrb[0].mxu1  ;;  %v577_v12 = vpop.f32.mrb[1].mxu0 }
 0x118   :  { %v328_v13 = vsel %vm955_vm12, %v323_v11, -3.4028235e+38  ;;  %v330_v14 = vmul.f32 10.0, %v323_v11  ;;  %v612_v15 = vpop.f32.mrb[1].mxu1  ;;  %v381_v11 = vpop.permute.xlu0 %380 }
 0x119   :  { %v331_v16 = vsel %vm951_vm11, %v329_v9, -1e+30  ;;  %v378_v9 = vand.u32 127, %v72_v58 }
 0x11a   :  { %v333_v18 = vrot.slane %v331_v16, 4  ;;  %v332_v20 = vsel %vm955_vm12, %v330_v14, -1e+30 }
 0x11b   :  { %v339_v21 = vrot.slane %v332_v20, 4  ;;  %vm385_vm13 = vcmp.eq.s32.totalorder %v378_v9, %v381_v11 }
 0x11c   :  { %v334_v22 = vmax.f32 %v331_v16, %v333_v18 }
 0x11d   :  { %v340_v23 = vmax.f32 %v332_v20, %v339_v21 }
 0x11e   :  { %v335_v24 = vrot.slane %v334_v22, 2 }
 0x11f   :  { %v341_v25 = vrot.slane %v340_v23, 2 }
 0x120   :  { %v336_v26 = vmax.f32 %v334_v22, %v335_v24 }
 0x121   :  { %v342_v27 = vmax.f32 %v340_v23, %v341_v25 }
 0x122   :  { %v337_v28 = vrot.slane %v336_v26, 1 }
 0x123   :  { %v343_v29 = vrot.slane %v342_v27, 1 }
 0x124   :  { %v338_v30 = vmax.f32 %v336_v26, %v337_v28  ;;  %v507_v28 = vsel %vm56_vm3, 1.0, %v730_v8 }
 0x125   :  { %v344_v31 = vmax.f32 %v342_v27, %v343_v29 }
 0x126   :  { %v345_v32 = vsub.f32 %v331_v16, %v338_v30  ;;  %v508_v30 = vsel %vm57_vm4, 1.0, %v730_v8 }
 0x127   :  { %v346_v33 = vsub.f32 %v332_v20, %v344_v31 }
 0x128   :  { %v347_v34 = vmul.f32 1.442695, %v345_v32 }
 0x129   :  { %v349_v35 = vmul.f32 1.442695, %v346_v33 }
 0x12a   :  { %688 = vpow2.f32 %v347_v34 }
 0x12b   :  { %690 = vpow2.f32 %v349_v35 }
 0x134   :  { %v689_v36 = vpop.eup %688 }
 0x135   :  { %v691_v37 = vpop.eup %690  ;;  %v351_v38 = vrot.slane %v689_v36, 4 }
 0x136   :  { %v357_v39 = vrot.slane %v691_v37, 4 }
 0x137   :  { %v352_v40 = vadd.f32 %v689_v36, %v351_v38  ;;  %v437_v38 = vsel %vm423_vm15, %v508_v30, 0.0 }
 0x138   :  { %v358_v41 = vadd.f32 %v691_v37, %v357_v39 }
 0x139   :  { %v353_v42 = vrot.slane %v352_v40, 2 }
 0x13a   :  { %v359_v43 = vrot.slane %v358_v41, 2 }
 0x13b   :  { %v354_v44 = vadd.f32 %v353_v42, %v352_v40 }
 0x13c   :  { %v360_v45 = vadd.f32 %v359_v43, %v358_v41 }
 0x13d   :  { %v355_v46 = vrot.slane %v354_v44, 1 }
 0x13e   :  { %v361_v47 = vrot.slane %v360_v45, 1 }
 0x13f   :  { %v356_v48 = vadd.f32 %v355_v46, %v354_v44 }
 0x140   :  { %v362_v49 = vadd.f32 %v361_v47, %v360_v45 }
 0x141   :  { %692 = vrcp.f32 %v356_v48 }
 0x142   :  { %694 = vrcp.f32 %v362_v49 }
 0x14b   :  { %v693_v50 = vpop.eup %692 }
 0x14c   :  { %v695_v51 = vpop.eup %694  ;;  %v365_v52 = vmul.f32 %v693_v50, %v356_v48 }
 0x14d   :  { %v366_v53 = vmul.f32 %v695_v51, %v362_v49 }
 0x14e   :  { %v367_v54 = vsub.f32 2.0, %v365_v52 }
 0x14f   :  { %v368_v55 = vsub.f32 2.0, %v366_v53 }
 0x150   :  { %v369_v56 = vmul.f32 %v693_v50, %v367_v54 }
 0x151   :  { %v370_v57 = vmul.f32 %v695_v51, %v368_v55 }
 0x152   :  { %v371_v59 = vmul.f32 %v689_v36, %v369_v56 }
 0x153   :  { %v372_v61 = vmul.f32 %v691_v37, %v370_v57  ;;  %v436_v37 = vsel %vm423_vm15, %v507_v28, 0.0 }
 0x154   :  { %v373_v62 = vmul.f32 %v371_v59, %v327_v10  ;;  %v438_v40 = vadd.f32 %v437_v38, %v436_v37 }
 0x155   :  { %v374_v63 = vmul.f32 %v372_v61, %v328_v13  ;;  %v505_v13 = vsel %vm385_vm13, 1.0, %v730_v8 }
 0x156   :  { %v375_v0 = vmul.f32 8.0, %v373_v62 }
 0x157   :  { %v376_v1 = vmul.f32 8.0, %v374_v63 }
 0x158   :  { %391 = vmax.xlane.f32.xlu1 %v375_v0  ;;  %v411_v14 = vmul.f32 %v505_v13, %v375_v0 }
 0x15c   :  { %393 = vmax.xlane.f32.xlu1 %v376_v1 }
 0x16d   :  { %383 = vperm.xlu1 %687, %v820_v19  }
 0x1e5   :  { %v392_v2 = vpop.xlane.xlu1 %391 }
 0x1e6   :  { %v395_v3 = vsub.f32 %v375_v0, %v392_v2 }
 0x1e8   :  { %v397_v4 = vmul.f32 1.442695, %v395_v3 }
 0x1e9   :  { %v394_v5 = vpop.xlane.xlu1 %393 }
 0x1ea   :  { %696 = vpow2.f32 %v397_v4  ;;  %v396_v6 = vsub.f32 %v376_v1, %v394_v5 }
 0x1ec   :  { %v399_v7 = vmul.f32 1.442695, %v396_v6 }
 0x1ed   :  { %v384_v12 = vpop.permute.xlu1 %383 }
 0x1ee   :  { %698 = vpow2.f32 %v399_v7  ;;  %vm386_vm14 = vcmp.eq.s32.totalorder %v378_v9, %v384_v12 }
 0x1ef   :  { %v506_v16 = vsel %vm386_vm14, 1.0, %v730_v8 }
 0x1f0   :  { %v412_v18 = vmul.f32 %v506_v16, %v376_v1 }
 0x1f4   :  { %v697_v10 = vpop.eup %696 }
 0x1f5   :  { %401 = vadd.xlane.f32.xlu0 %v697_v10 }
 0x1f8   :  { %v699_v15 = vpop.eup %698 }
 0x1f9   :  { %403 = vadd.xlane.f32.xlu1 %v699_v15  ;;  %413 = vadd.xlane.f32.xlu0 %v411_v14 }
 0x1fd   :  { %415 = vadd.xlane.f32.xlu0 %v412_v18 }
 0x282   :  { %v402_v20 = vpop.xlane.xlu0 %401 }
 0x283   :  { %700 = vlog2.f32 %v402_v20 }
 0x286   :  { %v404_v21 = vpop.xlane.xlu1 %403  ;;  %v414_v23 = vpop.xlane.xlu0 %413 }
 0x287   :  { %702 = vlog2.f32 %v404_v21 }
 0x28a   :  { %v416_v31 = vpop.xlane.xlu0 %415 }
 0x28d   :  { %v701_v58 = vpop.eup %700 }
 0x28e   :  { %v406_v22 = vmul.f32 0.6931472, %v701_v58 }
 0x290   :  { %v409_v24 = vadd.f32 %v406_v22, %v392_v2 }
 0x291   :  { %v703_v25 = vpop.eup %702 }
 0x292   :  { %v408_v26 = vmul.f32 0.6931472, %v703_v25  ;;  %v419_v27 = vsub.f32 %v409_v24, %v414_v23 }
 0x294   :  { %v410_v29 = vadd.f32 %v408_v26, %v394_v5  ;;  %v421_v32 = vmul.f32 %v507_v28, %v419_v27 }
 0x296   :  { %v420_v33 = vsub.f32 %v410_v29, %v416_v31  ;;  %v424_v35 = vsel %vm423_vm15, %v421_v32, 0.0 }
 0x298   :  { %v422_v34 = vmul.f32 %v508_v30, %v420_v33 }
 0x29a   :  { %v425_v36 = vsel %vm423_vm15, %v422_v34, 0.0 }
 0x29b   :  { %v426_v39 = vadd.f32 %v425_v36, %v424_v35 }
 0x29d   :  { %427 = vadd.xlane.f32.xlu0 %v426_v39 }
 0x2a1   :  { %439 = vadd.xlane.f32.xlu0 %v438_v40 }
 0x32a   :  { %v428_v17 = vpop.xlane.xlu0 %427 }
 0x32b   :  { %v429_v41 = vrot.slane %v428_v17, 4 }
 0x32d   :  { %v430_v42 = vadd.f32 %v429_v41, %v428_v17 }
 0x32e   :  { %v440_v43 = vpop.xlane.xlu0 %439 }
 0x32f   :  { %v431_v44 = vrot.slane %v430_v42, 2  ;;  %v441_v19 = vrot.slane %v440_v43, 4 }
 0x331   :  { %v442_v8 = vadd.f32 %v441_v19, %v440_v43  ;;  %v432_v45 = vadd.f32 %v431_v44, %v430_v42 }
 0x333   :  { %v443_v46 = vrot.slane %v442_v8, 2  ;;  %v433_v47 = vrot.slane %v432_v45, 1 }
 0x335   :  { %v444_v48 = vadd.f32 %v443_v46, %v442_v8  ;;  %v434_v49 = vadd.f32 %v433_v47, %v432_v45 }
 0x337   :  { %677 = vpush %v434_v49  ;;  %v445_v50 = vrot.slane %v444_v48, 1 }
 0x339   :  { %v446_v51 = vadd.f32 %v445_v50, %v444_v48 }
 0x33b   :  { %679 = vpush %v446_v51 }
 0x368   :  { %s678_s1 = spop %677 }
 0x369   :  { %v454_v53 = vstv %s678_s1 }
 0x36c   :  { %s680_s11 = spop %679 }
 0x36d   :  { %v452_v52 = vstv %s680_s11 }
 0x36e   :  { %v453_v54 = vsel %vm451_vm0, %v452_v52, 0.0 }
 0x36f   :  { %v455_v55 = vsel %vm450_vm1, %v454_v53, %v453_v54 }
 0x370   :  { %456 = vst [vmem:[#allocation2] sm:$0xff] %v455_v55 }
 0x371   :  { %715 = shalt.err (!%p712_p4)
}
 0x372   :  { %s716_s15 = scalar_lea.hbm %s995_s4, 128 }
 0x373   :  { %p717_p5 = scmp.ne.s32.totalorder %s995_s4, %s716_s15  ;;  %p720_p6 = scmp.lt.u32.totalorder %s716_s15, %s995_s4 }
 0x375   :  { %p722_p7 = pnand %p720_p6, %p717_p5 }
 0x377   :  { %725 = shalt.err (!%p722_p7)
}
 0x378   :  { %466 = dma.vmem_to_hbm [thread:$0]  %s464_s10, 128, %s995_s4, [#allocation3]  }
 0x379   :  { %726 = dma.done.wait [#allocation3], 128  }
 0x37a   :  { %727 = vsyncadd [#allocation3], 4294967168 }
 0x37b   :  { %470 = vsyncpa [#allocation3], 1 }

</bundles_post_ra>
